<compile_context>
chip_gen: v7x
topology: tpu7x:2x2x1
jax: 0.10.0
libtpu: 0.0.40
codegen_flags: <defaults>
</compile_context>

<pallas_src>
import math

import jax
import jax.numpy as jnp
from jax.experimental import pallas as pl
from jax.experimental.pallas import tpu as pltpu


_LANES = 128            # complex pairs per 2-D row -> output rows are exactly
                        # one vreg wide (dense, unmasked stores)
_ROW_IN = 2 * _LANES    # interleaved (re, im) elements per input row
_MAX_BLOCK_ROWS = 4096  # 4 MiB input block + 2 MiB output block (f32)


def _complex_norm_kernel(x_ref, o_ref):
    # x_ref: (tm, 256) interleaved [re, im, re, im, ...] along lanes.
    # o_ref: (tm, 128) magnitudes.
    x = x_ref[...].astype(jnp.float32)
    sq = x * x  # VPU; exact up to one f32 rounding

    # Pair-sum compaction as a matmul with an exact 0/1 matrix:
    #   P[k, j] = 1  iff  k // 2 == j           (shape (256, 128))
    # so (sq @ P)[r, j] = sq[r, 2j] + sq[r, 2j+1] = re^2 + im^2.
    k_idx = jax.lax.broadcasted_iota(jnp.int32, (_ROW_IN, _LANES), 0)
    j_idx = jax.lax.broadcasted_iota(jnp.int32, (_ROW_IN, _LANES), 1)
    pair = ((k_idx >> 1) == j_idx).astype(jnp.bfloat16)

    # Exact bf16 hi/lo split of sq: hi + lo reconstructs sq to ~2^-18 relative,
    # and bf16 x {0,1} products accumulate exactly in the f32 MXU accumulator,
    # so the result does not depend on how the MXU would round f32 operands.
    hi = sq.astype(jnp.bfloat16)
    lo = (sq - hi.astype(jnp.float32)).astype(jnp.bfloat16)
    ssum = (jnp.dot(hi, pair, preferred_element_type=jnp.float32)
            + jnp.dot(lo, pair, preferred_element_type=jnp.float32))

    o_ref[...] = jnp.sqrt(ssum).astype(o_ref.dtype)


def _complex_norm_rows(x2d):
    """x2d: (rows, 256) interleaved pairs -> (rows, 128) magnitudes."""
    rows, _ = x2d.shape

    if rows <= _MAX_BLOCK_ROWS:
        tm = rows                                    # single block (full-extent dims OK)
    else:
        nblk = pl.cdiv(rows, _MAX_BLOCK_ROWS)        # balance blocks, round to sublane
        tm = ((pl.cdiv(rows, nblk) + 7) // 8) * 8    # multiple of 8, <= 4096
    grid = (pl.cdiv(rows, tm),)                      # ragged edge rows are discarded on store

    return pl.pallas_call(
        _complex_norm_kernel,
        out_shape=jax.ShapeDtypeStruct((rows, _LANES), x2d.dtype),
        grid_spec=pltpu.PrefetchScalarGridSpec(
            num_scalar_prefetch=0,
            grid=grid,
            in_specs=[pl.BlockSpec((tm, _ROW_IN), lambda i: (i, 0))],
            out_specs=pl.BlockSpec((tm, _LANES), lambda i: (i, 0)),
        ),
        compiler_params=pltpu.CompilerParams(
            dimension_semantics=("parallel",),       # shard row blocks across v7x cores
            vmem_limit_bytes=32 << 20,               # ~12 MiB live; safe on v5e/v6e/v7x
        ),
    )(x2d)


def complex_norm(spec):
    """JAX/Pallas equivalent of ComplexNorm.forward (power=1.0, mono=False).

    Accepts a single array of shape (..., 2) or a list of such arrays.
    Returns magnitudes of shape (...) (list-in -> list-out, like the module).
    """
    if isinstance(spec, (list, tuple)):
        return [complex_norm(b) for b in spec]

    assert spec.shape[-1] == 2, "last dim must be the (re, im) pair"
    out_shape = spec.shape[:-1]
    total = math.prod(out_shape)  # number of complex elements

    # Free reshape: flat interleaved [re0, im0, re1, im1, ...].
    flat = spec.reshape(-1)
    rows = pl.cdiv(total, _LANES)
    padded_len = rows * _ROW_IN
    if padded_len != flat.shape[0]:
        # Tail-pad with zeros so the flat array factors as (rows, 256).
        # Only triggers when total % 128 != 0; costs one extra XLA pass.
        flat = jnp.pad(flat, (0, padded_len - flat.shape[0]))
    x2d = flat.reshape(rows, _ROW_IN)

    out2d = _complex_norm_rows(x2d)

    out_flat = out2d.reshape(-1)
    if out_flat.shape[0] != total:
        out_flat = out_flat[:total]
    return out_flat.reshape(out_shape)


if __name__ == "__main__":
    key = jax.random.PRNGKey(0)
    k1, k2, k3 = jax.random.split(key, 3)

    # (batch=2, channels=4, freq=16, time=16, complex=2) -> divisible, no padding.
    x = jax.random.normal(k1, (2, 4, 16, 16, 2), dtype=jnp.float32)
    out = jax.block_until_ready(complex_norm(x))
    ref = jnp.sqrt(x[..., 0] ** 2 + x[..., 1] ** 2)
    assert out.shape == (2, 4, 16, 16)
    assert jnp.allclose(out, ref, atol=1e-6, rtol=1e-5)

    # List-input path, mirroring the PyTorch module.
    y = jax.random.normal(k2, (2, 4, 8, 16, 2), dtype=jnp.float32)
    outs = complex_norm([x, y])
    jax.block_until_ready(outs[1])
    ref_y = jnp.sqrt(y[..., 0] ** 2 + y[..., 1] ** 2)
    assert outs[0].shape == (2, 4, 16, 16) and outs[1].shape == (2, 4, 8, 16)
    assert jnp.allclose(outs[1], ref_y, atol=1e-6, rtol=1e-5)

    # Non-(128)-divisible shape -> exercises the padded-tail path.
    z = jax.random.normal(k3, (3, 5, 7, 2), dtype=jnp.float32)
    out_z = jax.block_until_ready(complex_norm(z))
    ref_z = jnp.sqrt(z[..., 0] ** 2 + z[..., 1] ** 2)
    assert out_z.shape == (3, 5, 7)
    assert jnp.allclose(out_z, ref_z, atol=1e-6, rtol=1e-5)

    print("KERNEL_OK")
</pallas_src>

<mosaic_0001>
module attributes {stable_mosaic.version = 11 : i64} {
  func.func @_complex_norm_kernel(%arg0: i32, %arg1: memref<16x256xf32, #tpu.memory_space<vmem>>, %arg2: memref<16x128xf32, #tpu.memory_space<vmem>>) attributes {dimension_semantics = [#tpu.dimension_semantics<parallel>], iteration_bounds = array<i64: 1>, scalar_prefetch = 0 : i64, scratch_operands = 0 : i64, tpu.core_type = #tpu.core_type<tc>, window_params = [{transform_indices = @transform_0, window_bounds = array<i64: 16, 256>}, {transform_indices = @transform_1, window_bounds = array<i64: 16, 128>}]} {
    %c0 = arith.constant 0 : index
    %c0_0 = arith.constant 0 : index
    %0 = vector.load %arg1[%c0, %c0_0] : memref<16x256xf32, #tpu.memory_space<vmem>>, vector<16x256xf32>
    %1 = arith.mulf %0, %0 : vector<16x256xf32>
    %2 = tpu.iota {dimensions = array<i32: 0>} : vector<256x128xi32>
    %3 = tpu.iota {dimensions = array<i32: 1>} : vector<256x128xi32>
    %c1_i32 = arith.constant 1 : i32
    %4 = vector.broadcast %c1_i32 : i32 to vector<256x128xi32>
    %5 = arith.shrsi %2, %4 : vector<256x128xi32>
    %6 = arith.cmpi eq, %5, %3 : vector<256x128xi32>
    %7 = arith.extui %6 : vector<256x128xi1> to vector<256x128xi32>
    %8 = arith.sitofp %7 : vector<256x128xi32> to vector<256x128xf32>
    %9 = arith.truncf %8 : vector<256x128xf32> to vector<256x128xbf16>
    %10 = arith.truncf %1 : vector<16x256xf32> to vector<16x256xbf16>
    %11 = arith.extf %10 : vector<16x256xbf16> to vector<16x256xf32>
    %12 = arith.subf %1, %11 : vector<16x256xf32>
    %13 = arith.truncf %12 : vector<16x256xf32> to vector<16x256xbf16>
    %cst = arith.constant dense<0.000000e+00> : vector<16x128xf32>
    %14 = tpu.matmul %10, %9, %cst {dimension_numbers = #tpu.dot_dimension_numbers<[1], [0], [0], [1], [0, 0, 1, 1], [], []>} : vector<16x256xbf16>, vector<256x128xbf16>, vector<16x128xf32> -> vector<16x128xf32>
    %cst_1 = arith.constant dense<0.000000e+00> : vector<16x128xf32>
    %15 = tpu.matmul %13, %9, %cst_1 {dimension_numbers = #tpu.dot_dimension_numbers<[1], [0], [0], [1], [0, 0, 1, 1], [], []>} : vector<16x256xbf16>, vector<256x128xbf16>, vector<16x128xf32> -> vector<16x128xf32>
    %16 = arith.addf %14, %15 : vector<16x128xf32>
    %17 = math.sqrt %16 : vector<16x128xf32>
    %c0_2 = arith.constant 0 : index
    %c0_3 = arith.constant 0 : index
    %18 = vector.load %arg2[%c0_2, %c0_3] : memref<16x128xf32, #tpu.memory_space<vmem>>, vector<16x128xf32>
    tpu.vector_store %arg2[%c0_2, %c0_3], %17 {strides = array<i32>} : memref<16x128xf32, #tpu.memory_space<vmem>>, vector<16x128xf32>,
    return
  }
  func.func @transform_0(%arg0: i32) -> (i32, i32) {
    %c0_i32 = arith.constant 0 : i32
    %c0_i32_0 = arith.constant 0 : i32
    return %arg0, %c0_i32 : i32, i32
  }
  func.func @transform_1(%arg0: i32) -> (i32, i32) {
    %c0_i32 = arith.constant 0 : i32
    %c0_i32_0 = arith.constant 0 : i32
    return %arg0, %c0_i32 : i32, i32
  }
}

</mosaic_0001>

<bundles_post_ra>
// kernel: tpu_custom_call.1
= control target key start
LH: loop header
LB: loop body
LE: loop exit
PB: predicated region body
PF: predicated region fallthrough
CT: control target
= control target key end

     0   :  { %6 = vsyncpa [#allocation3], 0  ;;  %s872_s0 = inlined_call_operand.hbm [shape: f32[16,256], index: 0, kind: input, shape index: {}]   ;;  %s873_s1 = inlined_call_operand.hbm [shape: f32[16,128], index: 1, kind: output, shape index: {}]  }
   0x1   :  { %7 = vsyncpa [#allocation4], 0  ;;  %s537_s6 = smov [#allocation2]   ;;  %s489_s10 = scalar_lea.hbm %s872_s0, 512 }
   0x2   :  { %s13_s7 = sshll.u32 %s537_s6, 4  ;;  %p490_p0 = scmp.ne.s32.totalorder %s872_s0, %s489_s10  ;;  %s14_s7 = int_to_ptr.vmem [resolvable:$true] %s13_s7 }
   0x3   :  { %p493_p1 = scmp.lt.u32.totalorder %s489_s10, %s872_s0 }
   0x5   :  { %p495_p2 = pnand %p493_p1, %p490_p0 }
   0x7   :  { %498 = shalt.err (!%p495_p2)
}
   0x8   :  { %s499_s15 = scalar_lea.vmem %s14_s7, 512  ;;  %p504_p4 = scmp.lt.s32.totalorder %s14_s7, %s14_s7 }
   0x9   :  { %p500_p3 = scmp.ne.s32.totalorder %s14_s7, %s499_s15  ;;  %p505_p5 = scmp.lt.s32.totalorder %s499_s15, %s499_s15 }
   0xb   :  { %p506_p6 = por %p505_p5, %p504_p4 }
   0xd   :  { %p507_p7 = pnand %p506_p6, %p500_p3 }
   0xf   :  { %510 = shalt.err (!%p507_p7)
}
  0x10   :  { %s538_s16 = smov 256   ;;  %s539_s17 = smov 16   ;;  %v32_v0 = vlaneseq }
  0x11   :  { %19 = dma.hbm_to_vmem [thread:$0]  %s872_s0, 512, %s14_s7, [#allocation3], %s538_s16, %s538_s16, %s539_s17  }
  0x12   :  { %533 = dma.done.wait [#allocation3], 512  }
  0x13   :  { %534 = vsyncadd [#allocation3], 4294966784  ;;  %v566_v1 = vshrl.u32 %v32_v0, 7  ;;  %v568_v2 = vand.u32 127, %v32_v0  ;;  %v540_v25 = vmov 1.0|1.0  }
  0x14   :  { %v27_v24 = vld [vmem:[#allocation2 + $0x18] sm:$0xff]  ;;  %s541_s0 = smov [#allocation5]  }
  0x15   :  { %v49_v3 = vadd.s32 128, %v566_v1  ;;  %v50_v4 = vadd.s32 136, %v566_v1  ;;  %v34_v5 = vadd.s32 8, %v566_v1  ;;  %v67_v6 = vshra.s32 %v566_v1, 1  ;;  %s326_s20 = sshll.u32 %s541_s0, 4  ;;  %s327_s20 = int_to_ptr.vmem [resolvable:$true] %s326_s20 }
  0x16   :  { %v51_v7 = vadd.s32 144, %v566_v1  ;;  %v52_v8 = vadd.s32 152, %v566_v1  ;;  %v35_v9 = vadd.s32 16, %v566_v1  ;;  %v36_v10 = vadd.s32 24, %v566_v1  ;;  %s511_s21 = scalar_lea.vmem %s327_s20, 256  ;;  %p516_p9 = scmp.lt.s32.totalorder %s327_s20, %s327_s20 }
  0x17   :  { %v83_v11 = vshra.s32 %v49_v3, 1  ;;  %v84_v12 = vshra.s32 %v50_v4, 1  ;;  %v68_v13 = vshra.s32 %v34_v5, 1  ;;  %vm579_vm0 = vcmp.eq.s32.totalorder %v67_v6, %v568_v2  ;;  %p512_p8 = scmp.ne.s32.totalorder %s327_s20, %s511_s21  ;;  %p517_p10 = scmp.lt.s32.totalorder %s511_s21, %s511_s21 }
  0x18   :  { %v85_v15 = vshra.s32 %v51_v7, 1  ;;  %v86_v16 = vshra.s32 %v52_v8, 1  ;;  %v69_v17 = vshra.s32 %v35_v9, 1  ;;  %v70_v18 = vshra.s32 %v36_v10, 1 }
  0x19   :  { %vm115_vm1 = vcmp.eq.s32.totalorder %v83_v11, %v568_v2  ;;  %vm116_vm2 = vcmp.eq.s32.totalorder %v84_v12, %v568_v2  ;;  %vm586_vm3 = vcmp.eq.s32.totalorder %v68_v13, %v568_v2  ;;  %v53_v20 = vadd.s32 160, %v566_v1  ;;  %p518_p11 = por %p517_p10, %p516_p9 }
  0x1a   :  { %vm386_vm4 = vmpackc.low %vm116_vm2, %vm115_vm1  ;;  %vm592_vm5 = vcmp.eq.s32.totalorder %v85_v15, %v568_v2  ;;  %vm597_vm6 = vcmp.eq.s32.totalorder %v86_v16, %v568_v2  ;;  %vm602_vm7 = vcmp.eq.s32.totalorder %v69_v17, %v568_v2  ;;  %vm607_vm8 = vcmp.eq.s32.totalorder %v70_v18, %v568_v2  ;;  %v25_v16 = vld [vmem:[#allocation2 + $0x8] sm:$0xff] }
  0x1b   :  { %434 = vmatprep.subr.msk.bf16.mxu0 %vm386_vm4, %v540_v25  ;;  %456 = vmatprep.subr.msk.bf16.mxu1 %vm386_vm4, %v540_v25  ;;  %vm370_vm9 = vmpackc.low %vm586_vm3, %vm579_vm0  ;;  %v54_v26 = vadd.s32 168, %v566_v1  ;;  %v87_v27 = vshra.s32 %v53_v20, 1  ;;  %v37_v28 = vadd.s32 32, %v566_v1  ;;  %v38_v29 = vadd.s32 40, %v566_v1  ;;  %p519_p12 = pnand %p518_p11, %p512_p8 }
  0x1c   :  { %435 = vmatpush3.bf16.msk.msra.mxu0 %vm370_vm9, %v540_v25  ;;  %457 = vmatpush3.bf16.msk.msra.mxu1 %vm370_vm9, %v540_v25  ;;  %vm388_vm10 = vmpackc.low %vm597_vm6, %vm592_vm5  ;;  %v55_v30 = vadd.s32 176, %v566_v1  ;;  %v56_v31 = vadd.s32 184, %v566_v1  ;;  %v39_v32 = vadd.s32 48, %v566_v1  ;;  %v40_v33 = vadd.s32 56, %v566_v1 }
  0x1d   :  { %436 = vmatprep.subr.msk.bf16.mxu0 %vm388_vm10, %v540_v25  ;;  %458 = vmatprep.subr.msk.bf16.mxu1 %vm388_vm10, %v540_v25  ;;  %vm372_vm11 = vmpackc.low %vm607_vm8, %vm602_vm7  ;;  %v88_v34 = vshra.s32 %v54_v26, 1  ;;  %vm637_vm12 = vcmp.eq.s32.totalorder %v87_v27, %v568_v2  ;;  %v71_v36 = vshra.s32 %v37_v28, 1  ;;  %v72_v37 = vshra.s32 %v38_v29, 1  ;;  %v24_v26 = vld [vmem:[#allocation2] sm:$0xff] }
  0x1e   :  { %v89_v38 = vshra.s32 %v55_v30, 1  ;;  %v90_v39 = vshra.s32 %v56_v31, 1  ;;  %v73_v40 = vshra.s32 %v39_v32, 1  ;;  %v74_v41 = vshra.s32 %v40_v33, 1  ;;  %v26_v31 = vld [vmem:[#allocation2 + $0x10] sm:$0xff] }
  0x1f   :  { %vm120_vm13 = vcmp.eq.s32.totalorder %v88_v34, %v568_v2  ;;  %vm643_vm14 = vcmp.eq.s32.totalorder %v71_v36, %v568_v2  ;;  %vm648_vm15 = vcmp.eq.s32.totalorder %v72_v37, %v568_v2  ;;  %v57_v44 = vadd.s32 192, %v566_v1 }
  0x20   :  { %437 = vmatpush3.bf16.msk.msra.mxu0 %vm372_vm11, %v540_v25  ;;  %459 = vmatpush3.bf16.msk.msra.mxu1 %vm372_vm11, %v540_v25  ;;  %vm390_vm0 = vmpackc.low %vm120_vm13, %vm637_vm12  ;;  %vm658_vm1 = vcmp.eq.s32.totalorder %v89_v38, %v568_v2  ;;  %vm663_vm2 = vcmp.eq.s32.totalorder %v90_v39, %v568_v2  ;;  %vm668_vm3 = vcmp.eq.s32.totalorder %v73_v40, %v568_v2  ;;  %v58_v48 = vadd.s32 200, %v566_v1 }
  0x21   :  { %438 = vmatprep.subr.msk.bf16.mxu0 %vm390_vm0, %v540_v25  ;;  %460 = vmatprep.subr.msk.bf16.mxu1 %vm390_vm0, %v540_v25  ;;  %vm374_vm4 = vmpackc.low %vm648_vm15, %vm643_vm14  ;;  %vm680_vm5 = vcmp.eq.s32.totalorder %v74_v41, %v568_v2  ;;  %v91_v50 = vshra.s32 %v57_v44, 1  ;;  %v41_v51 = vadd.s32 64, %v566_v1  ;;  %v42_v52 = vadd.s32 72, %v566_v1 }
  0x22   :  { %vm392_vm6 = vmpackc.low %vm663_vm2, %vm658_vm1  ;;  %v92_v53 = vshra.s32 %v58_v48, 1  ;;  %v59_v54 = vadd.s32 208, %v566_v1  ;;  %v60_v55 = vadd.s32 216, %v566_v1  ;;  %v43_v56 = vadd.s32 80, %v566_v1 }
  0x23   :  { %vm694_vm7 = vcmp.eq.s32.totalorder %v91_v50, %v568_v2  ;;  %v75_v58 = vshra.s32 %v41_v51, 1  ;;  %v76_v59 = vshra.s32 %v42_v52, 1  ;;  %v44_v60 = vadd.s32 88, %v566_v1  ;;  %vm376_vm9 = vmpackc.low %vm680_vm5, %vm668_vm3 }
  0x24   :  { %439 = vmatpush3.bf16.msk.msra.mxu0 %vm374_vm4, %v540_v25  ;;  %461 = vmatpush3.bf16.msk.msra.mxu1 %vm374_vm4, %v540_v25  ;;  %vm702_vm8 = vcmp.eq.s32.totalorder %v92_v53, %v568_v2  ;;  %v93_v62 = vshra.s32 %v59_v54, 1  ;;  %v94_v63 = vshra.s32 %v60_v55, 1  ;;  %v77_v0 = vshra.s32 %v43_v56, 1 }
  0x25   :  { %440 = vmatprep.subr.msk.bf16.mxu0 %vm392_vm6, %v540_v25  ;;  %462 = vmatprep.subr.msk.bf16.mxu1 %vm392_vm6, %v540_v25  ;;  %v78_v3 = vshra.s32 %v44_v60, 1  ;;  %v61_v4 = vadd.s32 224, %v566_v1  ;;  %vm394_vm10 = vmpackc.low %vm702_vm8, %vm694_vm7  ;;  %vm718_vm11 = vcmp.eq.s32.totalorder %v75_v58, %v568_v2  ;;  %vm723_vm12 = vcmp.eq.s32.totalorder %v76_v59, %v568_v2 }
  0x26   :  { %vm728_vm13 = vcmp.eq.s32.totalorder %v93_v62, %v568_v2  ;;  %v62_v8 = vadd.s32 232, %v566_v1  ;;  %vm734_vm14 = vcmp.eq.s32.totalorder %v94_v63, %v568_v2  ;;  %v45_v11 = vadd.s32 96, %v566_v1  ;;  %vm378_vm15 = vmpackc.low %vm723_vm12, %vm718_vm11 }
  0x27   :  { %v95_v10 = vshra.s32 %v61_v4, 1  ;;  %v46_v12 = vadd.s32 104, %v566_v1  ;;  %v63_v14 = vadd.s32 240, %v566_v1  ;;  %v64_v15 = vadd.s32 248, %v566_v1  ;;  %vm396_vm2 = vmpackc.low %vm734_vm14, %vm728_vm13 }
  0x28   :  { %441 = vmatpush3.bf16.msk.msra.mxu0 %vm376_vm9, %v540_v25  ;;  %463 = vmatpush3.bf16.msk.msra.mxu1 %vm376_vm9, %v540_v25  ;;  %v96_v13 = vshra.s32 %v62_v8, 1  ;;  %vm761_vm0 = vcmp.eq.s32.totalorder %v77_v0, %v568_v2  ;;  %vm766_vm1 = vcmp.eq.s32.totalorder %v78_v3, %v568_v2  ;;  %v47_v19 = vadd.s32 112, %v566_v1 }
  0x29   :  { %442 = vmatprep.subr.msk.bf16.mxu0 %vm394_vm10, %v540_v25  ;;  %464 = vmatprep.subr.msk.bf16.mxu1 %vm394_vm10, %v540_v25  ;;  %vm776_vm3 = vcmp.eq.s32.totalorder %v95_v10, %v568_v2  ;;  %v79_v21 = vshra.s32 %v45_v11, 1  ;;  %v80_v22 = vshra.s32 %v46_v12, 1  ;;  %v48_v23 = vadd.s32 120, %v566_v1  ;;  %vm380_vm5 = vmpackc.low %vm766_vm1, %vm761_vm0 }
  0x2a   :  { %vm782_vm4 = vcmp.eq.s32.totalorder %v96_v13, %v568_v2  ;;  %v97_v28 = vshra.s32 %v63_v14, 1  ;;  %v98_v29 = vshra.s32 %v64_v15, 1  ;;  %v29_v30 = vmul.f32 %v25_v16, %v25_v16 }
  0x2b   :  { %v81_v1 = vshra.s32 %v47_v19, 1  ;;  %v31_v32 = vmul.f32 %v27_v24, %v27_v24  ;;  %v28_v33 = vmul.f32 %v24_v26, %v24_v26  ;;  %vm398_vm6 = vmpackc.low %vm782_vm4, %vm776_vm3  ;;  %vm809_vm7 = vcmp.eq.s32.totalorder %v79_v21, %v568_v2 }
  0x2c   :  { %443 = vmatpush3.bf16.msk.msra.mxu0 %vm378_vm15, %v540_v25  ;;  %465 = vmatpush3.bf16.msk.msra.mxu1 %vm378_vm15, %v540_v25  ;;  %vm814_vm8 = vcmp.eq.s32.totalorder %v80_v22, %v568_v2  ;;  %v82_v36 = vshra.s32 %v48_v23, 1  ;;  %v30_v37 = vmul.f32 %v26_v31, %v26_v31  ;;  %vm819_vm9 = vcmp.eq.s32.totalorder %v97_v28, %v568_v2 }
  0x2d   :  { %444 = vmatprep.subr.msk.bf16.mxu0 %vm396_vm2, %v540_v25  ;;  %466 = vmatprep.subr.msk.bf16.mxu1 %vm396_vm2, %v540_v25  ;;  %vm824_vm10 = vcmp.eq.s32.totalorder %v98_v29, %v568_v2  ;;  %v212_v40 = vpack.c.bf16 %v31_v32, %v29_v30  ;;  %vm382_vm11 = vmpackc.low %vm814_vm8, %vm809_vm7  ;;  %vm841_vm13 = vcmp.eq.s32.totalorder %v81_v1, %v568_v2 }
  0x2e   :  { %v211_v41 = vpack.c.bf16 %v30_v37, %v28_v33  ;;  %vm400_vm12 = vmpackc.low %vm824_vm10, %vm819_vm9  ;;  %vm846_vm14 = vcmp.eq.s32.totalorder %v82_v36, %v568_v2 }
  0x2f   :  { %v214_v42 = vunpack.c.l.bf16 %v212_v40  ;;  %v216_v43 = vunpack.c.h.bf16 %v212_v40  ;;  %296 = vmatprep.mubr.bf16.mxu1 %v212_v40  ;;  %vm384_vm15 = vmpackc.low %vm846_vm14, %vm841_vm13 }
  0x30   :  { %445 = vmatpush3.bf16.msk.msra.mxu0 %vm380_vm5, %v540_v25  ;;  %467 = vmatpush3.bf16.msk.msra.mxu1 %vm380_vm5, %v540_v25  ;;  %v213_v46 = vunpack.c.l.bf16 %v211_v41  ;;  %v215_v47 = vunpack.c.h.bf16 %v211_v41 }
  0x31   :  { %446 = vmatprep.subr.msk.bf16.mxu0 %vm398_vm6, %v540_v25  ;;  %468 = vmatprep.subr.msk.bf16.mxu1 %vm398_vm6, %v540_v25  ;;  %v218_v48 = vsub.f32 %v29_v30, %v214_v42  ;;  %v220_v49 = vsub.f32 %v31_v32, %v216_v43 }
  0x32   :  { %v217_v50 = vsub.f32 %v28_v33, %v213_v46  ;;  %v219_v51 = vsub.f32 %v30_v37, %v215_v47 }
  0x33   :  { %v222_v2 = vpack.c.bf16 %v220_v49, %v218_v48 }
  0x34   :  { %447 = vmatpush3.bf16.msk.msra.mxu0 %vm382_vm11, %v540_v25  ;;  %469 = vmatpush3.bf16.msk.msra.mxu1 %vm382_vm11, %v540_v25  ;;  %v221_v52 = vpack.c.bf16 %v219_v51, %v217_v50 }
  0x35   :  { %448 = vmatprep.subr.msk.bf16.mxu0 %vm400_vm12, %v540_v25  ;;  %470 = vmatprep.subr.msk.bf16.mxu1 %vm400_vm12, %v540_v25 }
  0x36   :  { %255 = vmatprep.mubr.bf16.mxu0 %v222_v2 }
  0x38   :  { %449 = vmatpush3.bf16.msk.msra.mxu0 %vm384_vm15, %v540_v25  ;;  %471 = vmatpush3.bf16.msk.msra.mxu1 %vm384_vm15, %v540_v25 }
  0x3b   :  { %256 = vmatmul.mubr.bf16.vlgmr.msra.gmra.mrb[0].mxu0 %v221_v52  ;;  %297 = vmatmul.mubr.bf16.vlgmr.msra.gmra.mrb[0].mxu1 %v211_v41 }
 0x10e   :  { %v450_v53 = vpop.f32.mrb[0].mxu0  ;;  %v472_v54 = vpop.f32.mrb[0].mxu1 }
 0x10f   :  { %v451_v55 = vpop.f32.mrb[1].mxu0  ;;  %v473_v56 = vpop.f32.mrb[1].mxu1 }
 0x110   :  { %v452_v57 = vadd.f32 %v451_v55, %v450_v53  ;;  %v474_v58 = vadd.f32 %v473_v56, %v472_v54  ;;  %v453_v59 = vpop.f32.mrb[2].mxu0  ;;  %v475_v60 = vpop.f32.mrb[2].mxu1 }
 0x111   :  { %v454_v61 = vpop.f32.mrb[3].mxu0  ;;  %v476_v62 = vpop.f32.mrb[3].mxu1 }
 0x112   :  { %v299_v63 = vadd.f32 %v474_v58, %v452_v57  ;;  %v455_v0 = vadd.f32 %v454_v61, %v453_v59  ;;  %v477_v3 = vadd.f32 %v476_v62, %v475_v60 }
 0x114   :  { %485 = vrsqrt.f32 %v299_v63  ;;  %v302_v4 = vadd.f32 %v477_v3, %v455_v0  ;;  %vm307_vm0 = vcmp.eq.f32.partialorder %v299_v63, inf  ;;  %v310_v7 = vand.u32 2147483648, %v299_v63 }
 0x115   :  { %vm309_vm1 = vcmp.eq.f32.partialorder %v299_v63, 0.0 }
 0x116   :  { %487 = vrsqrt.f32 %v302_v4  ;;  %vm314_vm2 = vcmp.eq.f32.partialorder %v302_v4, inf  ;;  %v317_v11 = vand.u32 2147483648, %v302_v4  ;;  %vm316_vm3 = vcmp.eq.f32.partialorder %v302_v4, 0.0 }
 0x11e   :  { %v486_v5 = vpop.eup %485 }
 0x11f   :  { %v306_v25 = vmul.f32 %v486_v5, %v299_v63 }
 0x120   :  { %v488_v6 = vpop.eup %487 }
 0x121   :  { %v308_v8 = vsel %vm307_vm0, %v299_v63, %v306_v25  ;;  %v313_v9 = vmul.f32 %v488_v6, %v302_v4 }
 0x122   :  { %v311_v10 = vsel %vm309_vm1, %v310_v7, %v308_v8 }
 0x123   :  { %v315_v12 = vsel %vm314_vm2, %v302_v4, %v313_v9  ;;  %319 = vst [vmem:[#allocation5] sm:$0xff] %v311_v10 }
 0x124   :  { %v318_v13 = vsel %vm316_vm3, %v317_v11, %v315_v12 }
 0x125   :  { %320 = vst [vmem:[#allocation5 + $0x8] sm:$0xff] %v318_v13 }
 0x126   :  { %522 = shalt.err (!%p519_p12)
}
 0x127   :  { %s523_s24 = scalar_lea.hbm %s873_s1, 256 }
 0x128   :  { %p524_p13 = scmp.ne.s32.totalorder %s873_s1, %s523_s24  ;;  %p527_p0 = scmp.lt.u32.totalorder %s523_s24, %s873_s1 }
 0x12a   :  { %p529_p1 = pnand %p527_p0, %p524_p13 }
 0x12c   :  { %532 = shalt.err (!%p529_p1)
}
 0x12d   :  { %s542_s29 = smov 128   ;;  %s543_s30 = smov 8  }
 0x12e   :  { %332 = dma.vmem_to_hbm [thread:$0]  %s327_s20, 256, %s873_s1, [#allocation4], %s542_s29, %s542_s29, %s543_s30  }
 0x12f   :  { %535 = dma.done.wait [#allocation4], 256  }
 0x130   :  { %536 = vsyncadd [#allocation4], 4294967040 }
 0x131   :  { %336 = vsyncpa [#allocation3], 1 }
 0x132   :  { %337 = vsyncpa [#allocation4], 1 }

</bundles_post_ra>
